<compile_context>
chip_gen: v5e
topology: v5e:2x2
jax: 0.10.0
libtpu: 0.0.40
codegen_flags: <defaults>
</compile_context>

<pallas_src>
import math
import numpy as np
import jax
import jax.numpy as jnp
from jax import lax
from jax.experimental import pallas as pl
from jax.experimental.pallas import tpu as pltpu

# ----------------------------- config / shapes ------------------------------
# hidden_size=32, num_attention_heads=4, head_ratio=2, conv_kernel_size=3
B, S, H = 2, 8, 32
NUM_HEADS, HEAD_RATIO = 4, 2
NH = NUM_HEADS // HEAD_RATIO          # effective attention heads = 2
DH = H // NUM_HEADS                   # attention_head_size = 8
AH = NH * DH                          # all_head_size = 16
K = 3                                 # conv_kernel_size (odd -> same-length)
PAD = K // 2
H2 = H // 2
BS = B * S                            # 16 rows processed in one step
LW = 128                              # slab / output lane width

# ---- packed parameter-slab layout (rows x 128 lanes, f32) ----
# Block A (rows 0..31): big (32-row) weights + small blocks in spare lanes.
C_WQKV = 0        # rows 0..31, lanes   0..47 : fused [wq|wk|wv]   (H, 3*AH)
C_PW   = 48       # rows 0..31, lanes  48..63 : pointwise conv     (H, AH)
C_MASK = 64       # rows 0..15, lanes  64..79 : additive attn mask (BS, BS)
C_WCK  = 80       # rows 0..15, lanes  80..85 : conv_attn_kernel W (AH, NH*K)
C_BND  = 88       # rows 0..15, lanes  88..89 : [keep_prev|keep_next] (BS, 2)
C_DW   = 96       # rows 0..2,  lanes 96..127 : depthwise taps     (K, H)
R_WOUT = 32       # rows 32..63, 128 lanes    : block-diag [wsl 0; 0 wcl] pad->128
R_BOUT = 64       # row 64, 128 lanes         : [bsl|bcl|0...]
R_BQKV = 65       # row 65, lanes 0..47       : fused [bq|bk|bv]
R_BSEP = 66       # row 66, lanes 0..15       : separable-conv bias
R_BCK  = 67       # row 67, lanes 0..5        : conv_attn_kernel bias
R_TOTAL = 72      # pad to a multiple of 8 rows


# ------------------------------- Pallas kernel -------------------------------
def convbert_mixed_attention_kernel(x_ref, w_ref, o_ref):
    f32 = jnp.float32
    x = x_ref[...]                                            # (BS, H)

    # ---- parameter loads: static slices of the packed slab ----
    wqkv = w_ref[0:H, C_WQKV:C_WQKV + 3 * AH]                 # (32, 48)
    pw   = w_ref[0:H, C_PW:C_PW + AH]                         # (32, 16)
    mask = w_ref[0:BS, C_MASK:C_MASK + BS]                    # (16, 16) 0 / -1e30
    wck  = w_ref[0:AH, C_WCK:C_WCK + NH * K]                  # (16, 6)
    keep_prev = w_ref[0:BS, C_BND:C_BND + 1]                  # (16, 1)
    keep_next = w_ref[0:BS, C_BND + 1:C_BND + 2]              # (16, 1)
    dw   = w_ref[0:K, C_DW:C_DW + H]                          # (3, 32)
    wout = w_ref[R_WOUT:R_WOUT + 2 * AH, :]                   # (32, 128) block-diag
    bout = w_ref[R_BOUT:R_BOUT + 1, :]                        # (1, 128)
    bqkv = w_ref[R_BQKV:R_BQKV + 1, 0:3 * AH]                 # (1, 48)
    bsep = w_ref[R_BSEP:R_BSEP + 1, 0:AH]                     # (1, 16)
    bck  = w_ref[R_BCK:R_BCK + 1, 0:NH * K]                   # (1, 6)

    def softmax(z):
        z = z - jnp.max(z, axis=-1, keepdims=True)
        e = jnp.exp(z)
        return e * pl.reciprocal(jnp.sum(e, axis=-1, keepdims=True), approx=True)

    # ---- fused Q / K / V projection: one (BS,H)@(H,3*AH) matmul ----
    qkv = jnp.dot(x, wqkv, preferred_element_type=f32) + bqkv      # (BS, 3*AH)
    q = qkv[:, 0 * AH:1 * AH]
    k = qkv[:, 1 * AH:2 * AH]
    v = qkv[:, 2 * AH:3 * AH]

    # ---- SDConv path: SeparableConv1d (depthwise K=3 + pointwise + bias) ----
    # +-1 sequence shifts as XLU sublane rolls + batch-boundary zero masks
    # (reproduces the zero-padded conv; wrapped rows are killed by the masks).
    x_prev = pltpu.roll(x, shift=1, axis=0) * keep_prev
    x_next = pltpu.roll(x, shift=BS - 1, axis=0) * keep_next
    dconv = x_prev * dw[0:1, :] + x * dw[1:2, :] + x_next * dw[2:3, :]
    ks = jnp.dot(dconv, pw, preferred_element_type=f32) + bsep     # (BS, AH)

    # dynamic lightweight-conv kernels
    ckl = jnp.dot(ks * q, wck, preferred_element_type=f32) + bck   # (BS, NH*K)

    v_prev = pltpu.roll(v, shift=1, axis=0) * keep_prev
    v_next = pltpu.roll(v, shift=BS - 1, axis=0) * keep_next

    # ---- standard self-attention (block-diag additive mask, hoisted) ----
    scale = 1.0 / math.sqrt(DH)
    out = jnp.zeros((BS, LW), f32) + bout                          # lane-dense acc
    for h in range(NH):
        qh = q[:, h * DH:(h + 1) * DH]
        kh = k[:, h * DH:(h + 1) * DH]
        vh = v[:, h * DH:(h + 1) * DH]
        s = lax.dot_general(qh, kh, (((1,), (1,)), ((), ())),
                            preferred_element_type=f32) * scale + mask   # (BS, BS)
        p = softmax(s)                                             # dropout p=0 (eval)
        ctx_h = jnp.dot(p, vh, preferred_element_type=f32)         # (BS, DH)
        # self_linear rows for this head (accumulate: no head concat/relayout)
        out = out + jnp.dot(ctx_h, wout[h * DH:(h + 1) * DH, :],
                            preferred_element_type=f32)

    # ---- lightweight conv heads (softmax over taps applied TWICE, per spec) ----
    for h in range(NH):
        w = softmax(softmax(ckl[:, h * K:(h + 1) * K]))            # (BS, K)
        conv_h = (v_prev[:, h * DH:(h + 1) * DH] * w[:, 0:1]
                  + v[:, h * DH:(h + 1) * DH] * w[:, 1:2]
                  + v_next[:, h * DH:(h + 1) * DH] * w[:, 2:3])    # (BS, DH)
        # conv_linear rows for this head
        out = out + jnp.dot(conv_h, wout[AH + h * DH:AH + (h + 1) * DH, :],
                            preferred_element_type=f32)

    # lanes 0..H-1 hold [self_out | conv_out]; lanes H..127 are exactly zero.
    o_ref[...] = out                                               # (BS, 128) dense store


def convbert_mixed_attention(hidden_states, slab):
    x2 = hidden_states.reshape(BS, H)        # fold batch: one step, one dense store
    out = pl.pallas_call(
        convbert_mixed_attention_kernel,
        out_shape=jax.ShapeDtypeStruct((BS, LW), jnp.float32),
        in_specs=[pl.BlockSpec(memory_space=pltpu.MemorySpace.VMEM),
                  pl.BlockSpec(memory_space=pltpu.MemorySpace.VMEM)],
        out_specs=pl.BlockSpec(memory_space=pltpu.MemorySpace.VMEM),
    )(x2, slab)
    return out[:, :H].reshape(B, S, H)


# ------------------------------ parameters -----------------------------------
def init_params(key):
    keys = iter(jax.random.split(key, 16))

    def nrm(shape, scale=0.02):
        return (scale * jax.random.normal(next(keys), shape)).astype(jnp.float32)

    return {
        # Linear layers stored as (in, out); biases as (1, out)
        "wq": nrm((H, AH)), "bq": nrm((1, AH)),
        "wk": nrm((H, AH)), "bk": nrm((1, AH)),
        "wv": nrm((H, AH)), "bv": nrm((1, AH)),
        # SeparableConv1d: depthwise weight (tap, channel) == torch (H,1,K) transposed,
        # pointwise weight (H, AH) == torch (AH,H,1) transposed, bias (1, AH)
        "dw": nrm((K, H), 0.25), "pw": nrm((H, AH), 0.25), "bsep": nrm((1, AH)),
        # conv_attn_kernel Linear(AH -> NH*K)
        "wck": nrm((AH, NH * K)), "bck": nrm((1, NH * K)),
        # self_linear / conv_linear (AH -> H/2)
        "wsl": nrm((AH, H2)), "bsl": nrm((1, H2)),
        "wcl": nrm((AH, H2)), "bcl": nrm((1, H2)),
    }


def pack_params(p):
    """Pack all parameters + precomputed masks into one (72, 128) f32 slab."""
    slab = jnp.zeros((R_TOTAL, LW), jnp.float32)

    def put(s, row, col, a):
        return s.at[row:row + a.shape[0], col:col + a.shape[1]].set(a)

    wqkv = jnp.concatenate([p["wq"], p["wk"], p["wv"]], axis=1)          # (H, 3*AH)
    bqkv = jnp.concatenate([p["bq"], p["bk"], p["bv"]], axis=1)          # (1, 3*AH)
    # block-diagonal output projection, padded to 128 lanes for a dense store
    wout = jnp.zeros((2 * AH, LW), jnp.float32)
    wout = wout.at[:AH, :H2].set(p["wsl"]).at[AH:, H2:H].set(p["wcl"])
    bout = jnp.zeros((1, LW), jnp.float32)
    bout = bout.at[:, :H2].set(p["bsl"]).at[:, H2:H].set(p["bcl"])

    # host-side precomputed masks (ride the single slab DMA for free)
    r = np.arange(BS)
    same = (r[:, None] // S) == (r[None, :] // S)
    mask_add = np.where(same, 0.0, -1e30).astype(np.float32)             # (BS, BS)
    bnd = np.stack([(r % S != 0).astype(np.float32),
                    (r % S != S - 1).astype(np.float32)], axis=1)        # (BS, 2)

    slab = put(slab, 0, C_WQKV, wqkv)
    slab = put(slab, 0, C_PW, p["pw"])
    slab = put(slab, 0, C_MASK, jnp.asarray(mask_add))
    slab = put(slab, 0, C_WCK, p["wck"])
    slab = put(slab, 0, C_BND, jnp.asarray(bnd))
    slab = put(slab, 0, C_DW, p["dw"])
    slab = put(slab, R_WOUT, 0, wout)
    slab = put(slab, R_BOUT, 0, bout)
    slab = put(slab, R_BQKV, 0, bqkv)
    slab = put(slab, R_BSEP, 0, p["bsep"])
    slab = put(slab, R_BCK, 0, p["bck"])
    return slab


# ------------------------- pure-JAX reference (check) -------------------------
def reference_forward(x, p):
    """Mirrors the PyTorch ConvBertMixedAttention.forward structure directly."""
    q = jnp.einsum("bsh,hd->bsd", x, p["wq"]) + p["bq"]
    k = jnp.einsum("bsh,hd->bsd", x, p["wk"]) + p["bk"]
    v = jnp.einsum("bsh,hd->bsd", x, p["wv"]) + p["bv"]

    def split(t):                                   # (B,S,AH) -> (B,NH,S,DH)
        return t.reshape(B, S, NH, DH).transpose(0, 2, 1, 3)

    qh, kh, vh = split(q), split(k), split(v)
    scores = jnp.einsum("bhqd,bhkd->bhqk", qh, kh) / math.sqrt(DH)
    probs = jax.nn.softmax(scores, axis=-1)
    ctx = jnp.einsum("bhqk,bhkd->bhqd", probs, vh).transpose(0, 2, 1, 3).reshape(B, S, AH)

    # SeparableConv1d
    xpad = jnp.pad(x, ((0, 0), (PAD, PAD), (0, 0)))
    dconv = sum(xpad[:, j:j + S, :] * p["dw"][j] for j in range(K))
    ks = jnp.einsum("bsh,hd->bsd", dconv, p["pw"]) + p["bsep"]

    # dynamic lightweight conv (softmax applied twice, per the spec module)
    ckl = jnp.einsum("bsd,dk->bsk", ks * q, p["wck"]) + p["bck"]
    ck = jax.nn.softmax(jax.nn.softmax(ckl.reshape(B, S, NH, K), axis=-1), axis=-1)
    vpad = jnp.pad(v, ((0, 0), (PAD, PAD), (0, 0))).reshape(B, S + 2 * PAD, NH, DH)
    conv = sum(vpad[:, j:j + S] * ck[..., j:j + 1] for j in range(K)).reshape(B, S, AH)

    self_out = jnp.einsum("bsd,de->bse", ctx, p["wsl"]) + p["bsl"]
    conv_out = jnp.einsum("bsd,de->bse", conv, p["wcl"]) + p["bcl"]
    return jnp.concatenate([self_out, conv_out], axis=-1)


# ----------------------------------- main -------------------------------------
if __name__ == "__main__":
    key = jax.random.PRNGKey(0)
    k_hs, k_p = jax.random.split(key)
    hidden_states = jax.random.normal(k_hs, (B, S, H), dtype=jnp.float32)
    params = init_params(k_p)
    slab = pack_params(params)

    out = jax.block_until_ready(convbert_mixed_attention(hidden_states, slab))
    ref = jax.block_until_ready(reference_forward(hidden_states, params))

    assert out.shape == (B, S, H)
    # Tolerance loosened slightly because every softmax denominator uses the
    # EUP approximate reciprocal; structural errors would be orders larger.
    np.testing.assert_allclose(np.asarray(out), np.asarray(ref), rtol=5e-3, atol=5e-4)
    print("KERNEL_OK")
</pallas_src>

<mosaic_0001>
module attributes {stable_mosaic.version = 11 : i64} {
  func.func @convbert_mixed_attention_kernel(%arg0: memref<16x32xf32, #tpu.memory_space<vmem>>, %arg1: memref<72x128xf32, #tpu.memory_space<vmem>>, %arg2: memref<16x128xf32, #tpu.memory_space<vmem>>) attributes {dimension_semantics = [], scalar_prefetch = 0 : i64, scratch_operands = 0 : i64, tpu.core_type = #tpu.core_type<tc>} {
    %c0 = arith.constant 0 : index
    %c0_0 = arith.constant 0 : index
    %0 = vector.load %arg0[%c0, %c0_0] : memref<16x32xf32, #tpu.memory_space<vmem>>, vector<16x32xf32>
    %c0_1 = arith.constant 0 : index
    %c0_2 = arith.constant 0 : index
    %1 = vector.load %arg1[%c0_1, %c0_2] : memref<72x128xf32, #tpu.memory_space<vmem>>, vector<32x48xf32>
    %c0_3 = arith.constant 0 : index
    %c48 = arith.constant 48 : index
    %2 = vector.load %arg1[%c0_3, %c48] : memref<72x128xf32, #tpu.memory_space<vmem>>, vector<32x16xf32>
    %c0_4 = arith.constant 0 : index
    %c64 = arith.constant 64 : index
    %3 = vector.load %arg1[%c0_4, %c64] : memref<72x128xf32, #tpu.memory_space<vmem>>, vector<16x16xf32>
    %c0_5 = arith.constant 0 : index
    %c80 = arith.constant 80 : index
    %4 = vector.load %arg1[%c0_5, %c80] : memref<72x128xf32, #tpu.memory_space<vmem>>, vector<16x6xf32>
    %c0_6 = arith.constant 0 : index
    %c88 = arith.constant 88 : index
    %5 = vector.load %arg1[%c0_6, %c88] : memref<72x128xf32, #tpu.memory_space<vmem>>, vector<16x1xf32>
    %c0_7 = arith.constant 0 : index
    %c89 = arith.constant 89 : index
    %6 = vector.load %arg1[%c0_7, %c89] : memref<72x128xf32, #tpu.memory_space<vmem>>, vector<16x1xf32>
    %c0_8 = arith.constant 0 : index
    %c96 = arith.constant 96 : index
    %7 = vector.load %arg1[%c0_8, %c96] : memref<72x128xf32, #tpu.memory_space<vmem>>, vector<3x32xf32>
    %c32 = arith.constant 32 : index
    %c0_9 = arith.constant 0 : index
    %8 = vector.load %arg1[%c32, %c0_9] : memref<72x128xf32, #tpu.memory_space<vmem>>, vector<32x128xf32>
    %c64_10 = arith.constant 64 : index
    %c0_11 = arith.constant 0 : index
    %9 = vector.load %arg1[%c64_10, %c0_11] : memref<72x128xf32, #tpu.memory_space<vmem>>, vector<1x128xf32>
    %c65 = arith.constant 65 : index
    %c0_12 = arith.constant 0 : index
    %10 = vector.load %arg1[%c65, %c0_12] : memref<72x128xf32, #tpu.memory_space<vmem>>, vector<1x48xf32>
    %c66 = arith.constant 66 : index
    %c0_13 = arith.constant 0 : index
    %11 = vector.load %arg1[%c66, %c0_13] : memref<72x128xf32, #tpu.memory_space<vmem>>, vector<1x16xf32>
    %c67 = arith.constant 67 : index
    %c0_14 = arith.constant 0 : index
    %12 = vector.load %arg1[%c67, %c0_14] : memref<72x128xf32, #tpu.memory_space<vmem>>, vector<1x6xf32>
    %cst = arith.constant dense<0.000000e+00> : vector<16x48xf32>
    %13 = tpu.matmul %0, %1, %cst {dimension_numbers = #tpu.dot_dimension_numbers<[1], [0], [0], [1], [0, 0, 1, 1], [], []>} : vector<16x32xf32>, vector<32x48xf32>, vector<16x48xf32> -> vector<16x48xf32>
    %14 = vector.broadcast %10 : vector<1x48xf32> to vector<16x48xf32>
    %15 = arith.addf %13, %14 : vector<16x48xf32>
    %16 = vector.extract_strided_slice %15 {offsets = [0, 0], sizes = [16, 16], strides = [1, 1]} : vector<16x48xf32> to vector<16x16xf32>
    %17 = vector.extract_strided_slice %15 {offsets = [0, 16], sizes = [16, 16], strides = [1, 1]} : vector<16x48xf32> to vector<16x16xf32>
    %18 = vector.extract_strided_slice %15 {offsets = [0, 32], sizes = [16, 16], strides = [1, 1]} : vector<16x48xf32> to vector<16x16xf32>
    %c1_i32 = arith.constant 1 : i32
    %19 = tpu.dynamic_rotate %0 by %c1_i32 dim 0 : vector<16x32xf32>, i32 -> vector<16x32xf32>
    %20 = vector.broadcast %5 : vector<16x1xf32> to vector<16x32xf32>
    %21 = arith.mulf %19, %20 : vector<16x32xf32>
    %c15_i32 = arith.constant 15 : i32
    %22 = tpu.dynamic_rotate %0 by %c15_i32 dim 0 : vector<16x32xf32>, i32 -> vector<16x32xf32>
    %23 = vector.broadcast %6 : vector<16x1xf32> to vector<16x32xf32>
    %24 = arith.mulf %22, %23 : vector<16x32xf32>
    %25 = vector.extract_strided_slice %7 {offsets = [0, 0], sizes = [1, 32], strides = [1, 1]} : vector<3x32xf32> to vector<1x32xf32>
    %26 = vector.broadcast %25 : vector<1x32xf32> to vector<16x32xf32>
    %27 = arith.mulf %21, %26 : vector<16x32xf32>
    %28 = vector.extract_strided_slice %7 {offsets = [1, 0], sizes = [1, 32], strides = [1, 1]} : vector<3x32xf32> to vector<1x32xf32>
    %29 = vector.broadcast %28 : vector<1x32xf32> to vector<16x32xf32>
    %30 = arith.mulf %0, %29 : vector<16x32xf32>
    %31 = arith.addf %27, %30 : vector<16x32xf32>
    %32 = vector.extract_strided_slice %7 {offsets = [2, 0], sizes = [1, 32], strides = [1, 1]} : vector<3x32xf32> to vector<1x32xf32>
    %33 = vector.broadcast %32 : vector<1x32xf32> to vector<16x32xf32>
    %34 = arith.mulf %24, %33 : vector<16x32xf32>
    %35 = arith.addf %31, %34 : vector<16x32xf32>
    %cst_15 = arith.constant dense<0.000000e+00> : vector<16x16xf32>
    %36 = tpu.matmul %35, %2, %cst_15 {dimension_numbers = #tpu.dot_dimension_numbers<[1], [0], [0], [1], [0, 0, 1, 1], [], []>} : vector<16x32xf32>, vector<32x16xf32>, vector<16x16xf32> -> vector<16x16xf32>
    %37 = vector.broadcast %11 : vector<1x16xf32> to vector<16x16xf32>
    %38 = arith.addf %36, %37 : vector<16x16xf32>
    %39 = arith.mulf %38, %16 : vector<16x16xf32>
    %cst_16 = arith.constant dense<0.000000e+00> : vector<16x6xf32>
    %40 = tpu.matmul %39, %4, %cst_16 {dimension_numbers = #tpu.dot_dimension_numbers<[1], [0], [0], [1], [0, 0, 1, 1], [], []>} : vector<16x16xf32>, vector<16x6xf32>, vector<16x6xf32> -> vector<16x6xf32>
    %41 = vector.broadcast %12 : vector<1x6xf32> to vector<16x6xf32>
    %42 = arith.addf %40, %41 : vector<16x6xf32>
    %c1_i32_17 = arith.constant 1 : i32
    %43 = tpu.dynamic_rotate %18 by %c1_i32_17 dim 0 : vector<16x16xf32>, i32 -> vector<16x16xf32>
    %44 = vector.broadcast %5 : vector<16x1xf32> to vector<16x16xf32>
    %45 = arith.mulf %43, %44 : vector<16x16xf32>
    %c15_i32_18 = arith.constant 15 : i32
    %46 = tpu.dynamic_rotate %18 by %c15_i32_18 dim 0 : vector<16x16xf32>, i32 -> vector<16x16xf32>
    %47 = vector.broadcast %6 : vector<16x1xf32> to vector<16x16xf32>
    %48 = arith.mulf %46, %47 : vector<16x16xf32>
    %cst_19 = arith.constant 0.000000e+00 : f32
    %49 = vector.broadcast %cst_19 : f32 to vector<16x128xf32>
    %50 = vector.broadcast %9 : vector<1x128xf32> to vector<16x128xf32>
    %51 = arith.addf %49, %50 : vector<16x128xf32>
    %52 = vector.extract_strided_slice %16 {offsets = [0, 0], sizes = [16, 8], strides = [1, 1]} : vector<16x16xf32> to vector<16x8xf32>
    %53 = vector.extract_strided_slice %17 {offsets = [0, 0], sizes = [16, 8], strides = [1, 1]} : vector<16x16xf32> to vector<16x8xf32>
    %54 = vector.extract_strided_slice %18 {offsets = [0, 0], sizes = [16, 8], strides = [1, 1]} : vector<16x16xf32> to vector<16x8xf32>
    %cst_20 = arith.constant dense<0.000000e+00> : vector<16x16xf32>
    %55 = tpu.matmul %52, %53, %cst_20 {dimension_numbers = #tpu.dot_dimension_numbers<[1], [1], [0], [0], [0, 0, 1, 0], [], []>} : vector<16x8xf32>, vector<16x8xf32>, vector<16x16xf32> -> vector<16x16xf32>
    %cst_21 = arith.constant 0.353553385 : f32
    %56 = vector.broadcast %cst_21 : f32 to vector<16x16xf32>
    %57 = arith.mulf %55, %56 : vector<16x16xf32>
    %58 = arith.addf %57, %3 : vector<16x16xf32>
    %cst_22 = arith.constant dense<0xFF800000> : vector<16xf32>
    %59 = vector.multi_reduction <maximumf>, %58, %cst_22 [1] : vector<16x16xf32> to vector<16xf32>
    %60 = vector.shape_cast %59 : vector<16xf32> to vector<16x1xf32>
    %61 = vector.broadcast %60 : vector<16x1xf32> to vector<16x16xf32>
    %62 = arith.subf %58, %61 : vector<16x16xf32>
    %63 = math.exp %62 : vector<16x16xf32>
    %cst_23 = arith.constant dense<0.000000e+00> : vector<16xf32>
    %64 = vector.multi_reduction <add>, %63, %cst_23 [1] : vector<16x16xf32> to vector<16xf32>
    %65 = vector.shape_cast %64 : vector<16xf32> to vector<16x1xf32>
    %66 = tpu.reciprocal %65 {approx = true} : vector<16x1xf32> -> vector<16x1xf32>
    %67 = vector.broadcast %66 : vector<16x1xf32> to vector<16x16xf32>
    %68 = arith.mulf %63, %67 : vector<16x16xf32>
    %cst_24 = arith.constant dense<0.000000e+00> : vector<16x8xf32>
    %69 = tpu.matmul %68, %54, %cst_24 {dimension_numbers = #tpu.dot_dimension_numbers<[1], [0], [0], [1], [0, 0, 1, 1], [], []>} : vector<16x16xf32>, vector<16x8xf32>, vector<16x8xf32> -> vector<16x8xf32>
    %70 = vector.extract_strided_slice %8 {offsets = [0, 0], sizes = [8, 128], strides = [1, 1]} : vector<32x128xf32> to vector<8x128xf32>
    %cst_25 = arith.constant dense<0.000000e+00> : vector<16x128xf32>
    %71 = tpu.matmul %69, %70, %cst_25 {dimension_numbers = #tpu.dot_dimension_numbers<[1], [0], [0], [1], [0, 0, 1, 1], [], []>} : vector<16x8xf32>, vector<8x128xf32>, vector<16x128xf32> -> vector<16x128xf32>
    %72 = arith.addf %51, %71 : vector<16x128xf32>
    %73 = vector.extract_strided_slice %16 {offsets = [0, 8], sizes = [16, 8], strides = [1, 1]} : vector<16x16xf32> to vector<16x8xf32>
    %74 = vector.extract_strided_slice %17 {offsets = [0, 8], sizes = [16, 8], strides = [1, 1]} : vector<16x16xf32> to vector<16x8xf32>
    %75 = vector.extract_strided_slice %18 {offsets = [0, 8], sizes = [16, 8], strides = [1, 1]} : vector<16x16xf32> to vector<16x8xf32>
    %cst_26 = arith.constant dense<0.000000e+00> : vector<16x16xf32>
    %76 = tpu.matmul %73, %74, %cst_26 {dimension_numbers = #tpu.dot_dimension_numbers<[1], [1], [0], [0], [0, 0, 1, 0], [], []>} : vector<16x8xf32>, vector<16x8xf32>, vector<16x16xf32> -> vector<16x16xf32>
    %cst_27 = arith.constant 0.353553385 : f32
    %77 = vector.broadcast %cst_27 : f32 to vector<16x16xf32>
    %78 = arith.mulf %76, %77 : vector<16x16xf32>
    %79 = arith.addf %78, %3 : vector<16x16xf32>
    %cst_28 = arith.constant dense<0xFF800000> : vector<16xf32>
    %80 = vector.multi_reduction <maximumf>, %79, %cst_28 [1] : vector<16x16xf32> to vector<16xf32>
    %81 = vector.shape_cast %80 : vector<16xf32> to vector<16x1xf32>
    %82 = vector.broadcast %81 : vector<16x1xf32> to vector<16x16xf32>
    %83 = arith.subf %79, %82 : vector<16x16xf32>
    %84 = math.exp %83 : vector<16x16xf32>
    %cst_29 = arith.constant dense<0.000000e+00> : vector<16xf32>
    %85 = vector.multi_reduction <add>, %84, %cst_29 [1] : vector<16x16xf32> to vector<16xf32>
    %86 = vector.shape_cast %85 : vector<16xf32> to vector<16x1xf32>
    %87 = tpu.reciprocal %86 {approx = true} : vector<16x1xf32> -> vector<16x1xf32>
    %88 = vector.broadcast %87 : vector<16x1xf32> to vector<16x16xf32>
    %89 = arith.mulf %84, %88 : vector<16x16xf32>
    %cst_30 = arith.constant dense<0.000000e+00> : vector<16x8xf32>
    %90 = tpu.matmul %89, %75, %cst_30 {dimension_numbers = #tpu.dot_dimension_numbers<[1], [0], [0], [1], [0, 0, 1, 1], [], []>} : vector<16x16xf32>, vector<16x8xf32>, vector<16x8xf32> -> vector<16x8xf32>
    %91 = vector.extract_strided_slice %8 {offsets = [8, 0], sizes = [8, 128], strides = [1, 1]} : vector<32x128xf32> to vector<8x128xf32>
    %cst_31 = arith.constant dense<0.000000e+00> : vector<16x128xf32>
    %92 = tpu.matmul %90, %91, %cst_31 {dimension_numbers = #tpu.dot_dimension_numbers<[1], [0], [0], [1], [0, 0, 1, 1], [], []>} : vector<16x8xf32>, vector<8x128xf32>, vector<16x128xf32> -> vector<16x128xf32>
    %93 = arith.addf %72, %92 : vector<16x128xf32>
    %94 = vector.extract_strided_slice %42 {offsets = [0, 0], sizes = [16, 3], strides = [1, 1]} : vector<16x6xf32> to vector<16x3xf32>
    %cst_32 = arith.constant dense<0xFF800000> : vector<16xf32>
    %95 = vector.multi_reduction <maximumf>, %94, %cst_32 [1] : vector<16x3xf32> to vector<16xf32>
    %96 = vector.shape_cast %95 : vector<16xf32> to vector<16x1xf32>
    %97 = vector.broadcast %96 : vector<16x1xf32> to vector<16x3xf32>
    %98 = arith.subf %94, %97 : vector<16x3xf32>
    %99 = math.exp %98 : vector<16x3xf32>
    %cst_33 = arith.constant dense<0.000000e+00> : vector<16xf32>
    %100 = vector.multi_reduction <add>, %99, %cst_33 [1] : vector<16x3xf32> to vector<16xf32>
    %101 = vector.shape_cast %100 : vector<16xf32> to vector<16x1xf32>
    %102 = tpu.reciprocal %101 {approx = true} : vector<16x1xf32> -> vector<16x1xf32>
    %103 = vector.broadcast %102 : vector<16x1xf32> to vector<16x3xf32>
    %104 = arith.mulf %99, %103 : vector<16x3xf32>
    %cst_34 = arith.constant dense<0xFF800000> : vector<16xf32>
    %105 = vector.multi_reduction <maximumf>, %104, %cst_34 [1] : vector<16x3xf32> to vector<16xf32>
    %106 = vector.shape_cast %105 : vector<16xf32> to vector<16x1xf32>
    %107 = vector.broadcast %106 : vector<16x1xf32> to vector<16x3xf32>
    %108 = arith.subf %104, %107 : vector<16x3xf32>
    %109 = math.exp %108 : vector<16x3xf32>
    %cst_35 = arith.constant dense<0.000000e+00> : vector<16xf32>
    %110 = vector.multi_reduction <add>, %109, %cst_35 [1] : vector<16x3xf32> to vector<16xf32>
    %111 = vector.shape_cast %110 : vector<16xf32> to vector<16x1xf32>
    %112 = tpu.reciprocal %111 {approx = true} : vector<16x1xf32> -> vector<16x1xf32>
    %113 = vector.broadcast %112 : vector<16x1xf32> to vector<16x3xf32>
    %114 = arith.mulf %109, %113 : vector<16x3xf32>
    %115 = vector.extract_strided_slice %45 {offsets = [0, 0], sizes = [16, 8], strides = [1, 1]} : vector<16x16xf32> to vector<16x8xf32>
    %116 = vector.extract_strided_slice %114 {offsets = [0, 0], sizes = [16, 1], strides = [1, 1]} : vector<16x3xf32> to vector<16x1xf32>
    %117 = vector.broadcast %116 : vector<16x1xf32> to vector<16x8xf32>
    %118 = arith.mulf %115, %117 : vector<16x8xf32>
    %119 = vector.extract_strided_slice %18 {offsets = [0, 0], sizes = [16, 8], strides = [1, 1]} : vector<16x16xf32> to vector<16x8xf32>
    %120 = vector.extract_strided_slice %114 {offsets = [0, 1], sizes = [16, 1], strides = [1, 1]} : vector<16x3xf32> to vector<16x1xf32>
    %121 = vector.broadcast %120 : vector<16x1xf32> to vector<16x8xf32>
    %122 = arith.mulf %119, %121 : vector<16x8xf32>
    %123 = arith.addf %118, %122 : vector<16x8xf32>
    %124 = vector.extract_strided_slice %48 {offsets = [0, 0], sizes = [16, 8], strides = [1, 1]} : vector<16x16xf32> to vector<16x8xf32>
    %125 = vector.extract_strided_slice %114 {offsets = [0, 2], sizes = [16, 1], strides = [1, 1]} : vector<16x3xf32> to vector<16x1xf32>
    %126 = vector.broadcast %125 : vector<16x1xf32> to vector<16x8xf32>
    %127 = arith.mulf %124, %126 : vector<16x8xf32>
    %128 = arith.addf %123, %127 : vector<16x8xf32>
    %129 = vector.extract_strided_slice %8 {offsets = [16, 0], sizes = [8, 128], strides = [1, 1]} : vector<32x128xf32> to vector<8x128xf32>
    %cst_36 = arith.constant dense<0.000000e+00> : vector<16x128xf32>
    %130 = tpu.matmul %128, %129, %cst_36 {dimension_numbers = #tpu.dot_dimension_numbers<[1], [0], [0], [1], [0, 0, 1, 1], [], []>} : vector<16x8xf32>, vector<8x128xf32>, vector<16x128xf32> -> vector<16x128xf32>
    %131 = arith.addf %93, %130 : vector<16x128xf32>
    %132 = vector.extract_strided_slice %42 {offsets = [0, 3], sizes = [16, 3], strides = [1, 1]} : vector<16x6xf32> to vector<16x3xf32>
    %cst_37 = arith.constant dense<0xFF800000> : vector<16xf32>
    %133 = vector.multi_reduction <maximumf>, %132, %cst_37 [1] : vector<16x3xf32> to vector<16xf32>
    %134 = vector.shape_cast %133 : vector<16xf32> to vector<16x1xf32>
    %135 = vector.broadcast %134 : vector<16x1xf32> to vector<16x3xf32>
    %136 = arith.subf %132, %135 : vector<16x3xf32>
    %137 = math.exp %136 : vector<16x3xf32>
    %cst_38 = arith.constant dense<0.000000e+00> : vector<16xf32>
    %138 = vector.multi_reduction <add>, %137, %cst_38 [1] : vector<16x3xf32> to vector<16xf32>
    %139 = vector.shape_cast %138 : vector<16xf32> to vector<16x1xf32>
    %140 = tpu.reciprocal %139 {approx = true} : vector<16x1xf32> -> vector<16x1xf32>
    %141 = vector.broadcast %140 : vector<16x1xf32> to vector<16x3xf32>
    %142 = arith.mulf %137, %141 : vector<16x3xf32>
    %cst_39 = arith.constant dense<0xFF800000> : vector<16xf32>
    %143 = vector.multi_reduction <maximumf>, %142, %cst_39 [1] : vector<16x3xf32> to vector<16xf32>
    %144 = vector.shape_cast %143 : vector<16xf32> to vector<16x1xf32>
    %145 = vector.broadcast %144 : vector<16x1xf32> to vector<16x3xf32>
    %146 = arith.subf %142, %145 : vector<16x3xf32>
    %147 = math.exp %146 : vector<16x3xf32>
    %cst_40 = arith.constant dense<0.000000e+00> : vector<16xf32>
    %148 = vector.multi_reduction <add>, %147, %cst_40 [1] : vector<16x3xf32> to vector<16xf32>
    %149 = vector.shape_cast %148 : vector<16xf32> to vector<16x1xf32>
    %150 = tpu.reciprocal %149 {approx = true} : vector<16x1xf32> -> vector<16x1xf32>
    %151 = vector.broadcast %150 : vector<16x1xf32> to vector<16x3xf32>
    %152 = arith.mulf %147, %151 : vector<16x3xf32>
    %153 = vector.extract_strided_slice %45 {offsets = [0, 8], sizes = [16, 8], strides = [1, 1]} : vector<16x16xf32> to vector<16x8xf32>
    %154 = vector.extract_strided_slice %152 {offsets = [0, 0], sizes = [16, 1], strides = [1, 1]} : vector<16x3xf32> to vector<16x1xf32>
    %155 = vector.broadcast %154 : vector<16x1xf32> to vector<16x8xf32>
    %156 = arith.mulf %153, %155 : vector<16x8xf32>
    %157 = vector.extract_strided_slice %18 {offsets = [0, 8], sizes = [16, 8], strides = [1, 1]} : vector<16x16xf32> to vector<16x8xf32>
    %158 = vector.extract_strided_slice %152 {offsets = [0, 1], sizes = [16, 1], strides = [1, 1]} : vector<16x3xf32> to vector<16x1xf32>
    %159 = vector.broadcast %158 : vector<16x1xf32> to vector<16x8xf32>
    %160 = arith.mulf %157, %159 : vector<16x8xf32>
    %161 = arith.addf %156, %160 : vector<16x8xf32>
    %162 = vector.extract_strided_slice %48 {offsets = [0, 8], sizes = [16, 8], strides = [1, 1]} : vector<16x16xf32> to vector<16x8xf32>
    %163 = vector.extract_strided_slice %152 {offsets = [0, 2], sizes = [16, 1], strides = [1, 1]} : vector<16x3xf32> to vector<16x1xf32>
    %164 = vector.broadcast %163 : vector<16x1xf32> to vector<16x8xf32>
    %165 = arith.mulf %162, %164 : vector<16x8xf32>
    %166 = arith.addf %161, %165 : vector<16x8xf32>
    %167 = vector.extract_strided_slice %8 {offsets = [24, 0], sizes = [8, 128], strides = [1, 1]} : vector<32x128xf32> to vector<8x128xf32>
    %cst_41 = arith.constant dense<0.000000e+00> : vector<16x128xf32>
    %168 = tpu.matmul %166, %167, %cst_41 {dimension_numbers = #tpu.dot_dimension_numbers<[1], [0], [0], [1], [0, 0, 1, 1], [], []>} : vector<16x8xf32>, vector<8x128xf32>, vector<16x128xf32> -> vector<16x128xf32>
    %169 = arith.addf %131, %168 : vector<16x128xf32>
    %c0_42 = arith.constant 0 : index
    %c0_43 = arith.constant 0 : index
    %170 = vector.load %arg2[%c0_42, %c0_43] : memref<16x128xf32, #tpu.memory_space<vmem>>, vector<16x128xf32>
    tpu.vector_store %arg2[%c0_42, %c0_43], %169 {strides = array<i32>} : memref<16x128xf32, #tpu.memory_space<vmem>>, vector<16x128xf32>,
    return
  }
}

</mosaic_0001>

<bundles_post_ra>
// kernel: tpu_custom_call.1
= control target key start
LH: loop header
LB: loop body
LE: loop exit
PB: predicated region body
PF: predicated region fallthrough
CT: control target
= control target key end

     0   :  { %7 = vsyncpa [#allocation3], 0  ;;  %s1247_s0 = inlined_call_operand.hbm [shape: f32[16,32], index: 0, kind: input, shape index: {}]   ;;  %s1248_s1 = inlined_call_operand.hbm [shape: f32[72,128], index: 1, kind: input, shape index: {}]   ;;  %s1249_s2 = inlined_call_operand.hbm [shape: f32[16,128], index: 2, kind: output, shape index: {}]  }
   0x1   :  { %8 = vsyncpa [#allocation6], 0 }
   0x2   :  { %9 = vsyncpa [#allocation4], 0  ;;  %s14_s11 = sshll.u32 %s1247_s0, 4  ;;  %s1015_s12 = smov [#allocation2]   ;;  %s15_s11 = int_to_ptr.hbm [resolvable:$true] %s14_s11 }
   0x3   :  { %s16_s13 = sshll.u32 %s1015_s12, 4  ;;  %s27_s16 = sshll.u32 %s1248_s1, 4  ;;  %s17_s13 = int_to_ptr.vmem [resolvable:$true] %s16_s13  ;;  %s28_s16 = int_to_ptr.hbm [resolvable:$true] %s27_s16 }
   0x4   :  { %s1016_s17 = smov 128   ;;  %s1017_s18 = smov 8  }
   0x5   :  { %22 = dma.hbm_to_vmem [thread:$0]  %s15_s11, 256, %s17_s13, [#allocation3], %s1016_s17, %s1016_s17, %s1017_s18  }
   0x6   :  { %s1018_s19 = smov [#allocation5]  }
   0x7   :  { %s29_s20 = sshll.u32 %s1018_s19, 4  ;;  %s30_s20 = int_to_ptr.vmem [resolvable:$true] %s29_s20 }
   0x8   :  { %35 = dma.hbm_to_vmem [thread:$0]  %s28_s16, 1152, %s30_s20, [#allocation6], %s1016_s17, %s1016_s17, %s1017_s18  }
   0x9   :  { %1009 = dma.done.wait [#allocation3], 256  }
   0xa   :  { %1010 = vsyncadd [#allocation3], 4294967040 }
   0xb   :  { %1011 = dma.done.wait [#allocation6], 1152  }
   0xc   :  { %1012 = vsyncadd [#allocation6], 4294966144  ;;  %v1019_v0 = vmov 89   ;;  %v1020_v1 = vmov 88   ;;  %v1065_v2 = vld [vmem:[#allocation5] sm:$0xff]  ;;  %v49_v3 = vld [vmem:[#allocation5 + $0x18] sm:$0xff]  ;;  %v92_v14 = vlaneseq }
   0xd   :  { %854 = vset.pattern.permute.xlu1 %v1019_v0  ;;  %848 = vset.pattern.permute.xlu0 %v1020_v1  ;;  %v48_v4 = vld [vmem:[#allocation5 + $0x10] sm:$0xff]  ;;  %v50_v5 = vld [vmem:[#allocation5] sm:$0x7]  ;;  %v1069_v6 = vld [vmem:[#allocation5 + $0x8] sm:$0xff]  ;;  %s1021_s0 = smov 32   ;;  %vm60_vm0 = vcmask 261120  }
   0xe   :  { %861 = vset.pattern.permute.xlu2 %v1019_v0  ;;  %115 = vperm.xlu1 %854, %v1065_v2   ;;  %v131_v7 = vperm.slane %v50_v5, 1  ;;  %v124_v8 = vperm.slane %v50_v5, 0  ;;  %v849_v9 = vpack.i.bf16 %v48_v4, %v49_v3  ;;  %v45_v10 = vld [vmem:[#allocation2 + $0x8] sm:$0xff]  ;;  %v140_v11 = vperm.slane %v50_v5, 2  ;;  %s1022_s1 = smov 80   ;;  %v44_v12 = vld [vmem:[#allocation2] sm:$0xff] }
   0xf   :  { %99 = vperm.xlu0 %848, %v1065_v2   ;;  %821 = vmatpush.msra.mxu3 %v49_v3  ;;  %v855_v13 = vpack.i.bf16 %v1065_v2, %v1069_v6  ;;  %s1023_s21 = smov 48   ;;  %v1081_v16 = vshrl.u32 %v92_v14, 7  ;;  %v90_v19 = vrot.slane %v44_v12, 7  ;;  %v91_v20 = vrot.slane %v45_v10, 7  ;;  %v885_v46 = vld [vmem:[#allocation5 + $0x41] ss:$0 sm:$0xff] }
  0x10   :  { %79 = vmatpush.msra.mxu0 %v49_v3  ;;  %133 = vrot.lane.b32.xlu2 %v131_v7, %s1021_s0  ;;  %v109_v21 = vrot.slane %v44_v12, 1  ;;  %v110_v22 = vrot.slane %v45_v10, 1  ;;  %s1024_s22 = smov 112   ;;  %s1025_s23 = smov 104   ;;  %vm258_vm3 = vcmask 64512   ;;  %vm202_vm4 = vcmask 130048  }
  0x11   :  { %822 = vmatpush.msra.mxu3 %v48_v4  ;;  %vm94_vm1 = vcmp.lt.s32.totalorder %v1081_v16, 1  ;;  %vm111_vm2 = vcmp.lt.s32.totalorder %v1081_v16, 7  ;;  %s1026_s24 = smov 120   ;;  %v886_v62 = vld [vmem:[#allocation5 + $0x42] ss:$0 sm:$0xff]  ;;  %vm633_vm5 = vcmask 48152  }
  0x12   :  { %80 = vmatpush.msra.mxu0 %v48_v4  ;;  %v96_v23 = vsel %vm94_vm1, %v91_v20, %v90_v19  ;;  %v112_v29 = vsel %vm111_vm2, %v109_v21, %v110_v22  ;;  %v95_v34 = vsel %vm94_vm1, %v90_v19, %v91_v20  ;;  %v113_v42 = vsel %vm111_vm2, %v110_v22, %v109_v21  ;;  %s1027_s25 = smov 64   ;;  %s1028_s26 = smov 125  }
  0x13   :  { %823 = vmatpush.msra.mxu3 %v1069_v6  ;;  %vm513_vm6 = vcmask 23552   ;;  %s1029_s27 = smov 96   ;;  %s1030_s28 = smov 88  }
  0x14   :  { %81 = vmatpush.msra.mxu0 %v1069_v6  ;;  %s1037_s29 = smov [#allocation7]   ;;  %s781_s5 = sshll.u32 %s1249_s2, 4  ;;  %s782_s5 = int_to_ptr.hbm [resolvable:$true] %s781_s5 }
  0x15   :  { %824 = vmatpush.msra.mxu3 %v1065_v2  ;;  %s779_s30 = sshll.u32 %s1037_s29, 4  ;;  %s780_s30 = int_to_ptr.vmem [resolvable:$true] %s779_s30 }
  0x16   :  { %126 = vrot.lane.b32.xlu1 %v124_v8, %s1021_s0  ;;  %796 = vmatmul.msk.f32.vlgmr.msra.gmra.mxu3 %vm60_vm0, %v45_v10 }
  0x17   :  { %850 = vrot.lane.b32.xlu0 %v849_v9, %s1022_s1  ;;  %860 = vset.pattern.permute.xlu1 %v1020_v1 }
  0x18   :  { %82 = vmatpush.msra.mxu0 %v1065_v2  ;;  %142 = vrot.lane.b32.xlu2 %v140_v11, %s1021_s0 }
  0x19   :  { %795 = vmatmul.msk.f32.vlgmr.msra.gmra.mxu0 %vm60_vm0, %v44_v12 }
  0x1e   :  { %104 = vperm.xlu1 %860, %v1069_v6  }
  0x1f   :  { %856 = vrot.lane.b32.xlu0 %v855_v13, %s1022_s1 }
  0x20   :  { %119 = vperm.xlu2 %861, %v1069_v6  }
  0x27   :  { %863 = vrot.lane.b32.xlu0 %v855_v13, %s1023_s21 }
  0x6a   :  { %v134_v15 = vpop.permute.xlu2 %133 }
  0x6b   :  { %v136_v31 = vmul.f32 %v134_v15, %v44_v12  ;;  %v137_v47 = vmul.f32 %v134_v15, %v45_v10  ;;  %v887_v10 = vld [vmem:[#allocation5 + $0x43] ss:$0 sm:$0xff] }
  0x72   :  { %v143_v26 = vpop.permute.xlu2 %142 }
  0x7a   :  { %v1100_v41 = vpop.permute.xlu2 %119 }
  0x7b   :  { %v123_v48 = vmul.f32 %v1100_v41, %v113_v42 }
  0x7d   :  { %v146_v52 = vmul.f32 %v143_v26, %v123_v48 }
  0x80   :  { %v1083_v17 = vpop.permute.xlu1 %115 }
  0x81   :  { %v1085_v18 = vpop.permute.xlu0 %99  ;;  %v122_v33 = vmul.f32 %v1083_v17, %v112_v29 }
  0x82   :  { %v107_v28 = vmul.f32 %v1085_v18, %v96_v23 }
  0x83   :  { %v145_v40 = vmul.f32 %v143_v26, %v122_v33 }
  0x88   :  { %v127_v24 = vpop.permute.xlu1 %126 }
  0x89   :  { %v851_v25 = vpop.permute.xlu0 %850  ;;  %v129_v32 = vmul.f32 %v127_v24, %v107_v28 }
  0x8a   :  { %v852_v27 = vunpack.i.l.bf16 %v851_v25  ;;  %v853_v30 = vunpack.i.h.bf16 %v851_v25 }
  0x8b   :  { %v138_v35 = vadd.f32 %v136_v31, %v129_v32 }
  0x8c   :  { %182 = vmatpush.msra.mxu1 %v852_v27 }
  0x8d   :  { %v147_v45 = vadd.f32 %v145_v40, %v138_v35 }
  0x8e   :  { %183 = vmatpush.msra.mxu1 %v853_v30 }
  0x90   :  { %v1097_v36 = vpop.permute.xlu1 %104 }
  0x91   :  { %v857_v37 = vpop.permute.xlu0 %856  ;;  %v108_v38 = vmul.f32 %v1097_v36, %v95_v34 }
  0x92   :  { %v858_v39 = vunpack.i.l.bf16 %v857_v37  ;;  %v859_v43 = vunpack.i.h.bf16 %v857_v37 }
  0x93   :  { %v130_v44 = vmul.f32 %v127_v24, %v108_v38 }
  0x94   :  { %184 = vmatpush.msra.mxu1 %v858_v39 }
  0x95   :  { %v139_v51 = vadd.f32 %v137_v47, %v130_v44 }
  0x96   :  { %185 = vmatpush.msra.mxu1 %v859_v43  ;;  %v84_v49 = vpop.f32.mrf.mxu0 }
  0x97   :  { %797 = vmatmul.msk.f32.vlgmr.msra.gmra.mxu1 %vm60_vm0, %v147_v45  ;;  %v1106_v50 = vadd.f32 %v885_v46, %v84_v49  ;;  %v148_v55 = vadd.f32 %v146_v52, %v139_v51 }
  0x99   :  { %254 = vrot.lane.b32.xlu2 %v1106_v50, %s1024_s22  ;;  %v87_v53 = vpop.f32.mrf.mxu3  ;;  %v864_v56 = vpop.permute.xlu0 %863 }
  0x9a   :  { %v1109_v54 = vadd.f32 %v885_v46, %v87_v53  ;;  %v865_v57 = vunpack.i.l.bf16 %v864_v56  ;;  %v866_v58 = vunpack.i.h.bf16 %v864_v56 }
  0x9c   :  { %256 = vrot.lane.b32.xlu1 %v1109_v54, %s1024_s22  ;;  %388 = vrot.lane.b32.xlu0 %v1109_v54, %s1025_s23 }
  0x9d   :  { %223 = vmatpush.msra.mxu2 %v865_v57 }
  0x9f   :  { %798 = vmatmul.msk.f32.gmra.mxu1 %vm60_vm0, %v148_v55  ;;  %224 = vmatpush.msra.mxu2 %v866_v58 }
  0xa1   :  { %382 = vrot.lane.b32.xlu2 %v1106_v50, %s1026_s24 }
  0xa4   :  { %386 = vrot.lane.b32.xlu1 %v1106_v50, %s1025_s23  ;;  %384 = vrot.lane.b32.xlu0 %v1109_v54, %s1026_s24 }
  0xf3   :  { %v255_v61 = vpop.permute.xlu2 %254 }
  0xfb   :  { %v383_v4 = vpop.permute.xlu2 %382 }
 0x10e   :  { %v257_v59 = vpop.permute.xlu1 %256  ;;  %v389_v60 = vpop.permute.xlu0 %388 }
 0x10f   :  { %801 = vmatpush.xpose.msk.msrb.mxu3 %vm258_vm3, %v257_v59  ;;  %809 = vmatpush.xpose.msk.msrb.mxu1 %vm258_vm3, %v389_v60 }
 0x113   :  { %802 = vmatpush.xpose.msk.msrb.mxu3 %vm258_vm3, %v255_v61 }
 0x114   :  { %v187_v63 = vpop.f32.mrf.mxu1 }
 0x115   :  { %v188_v0 = vadd.f32 %v886_v62, %v187_v63 }
 0x116   :  { %803 = vmatmul.msk.f32.vlgmr.msrb.gmra.mxu3 %vm258_vm3, %v1106_v50  ;;  %v387_v3 = vpop.permute.xlu1 %386  ;;  %v385_v9 = vpop.permute.xlu0 %384 }
 0x117   :  { %v193_v1 = vmul.f32 %v188_v0, %v1106_v50  ;;  %810 = vmatpush.xpose.msk.msrb.mxu1 %vm258_vm3, %v387_v3 }
 0x119   :  { %799 = vmatmul.msk.f32.vlgmr.msra.gmra.mxu2 %vm202_vm4, %v193_v1 }
 0x11a   :  { %811 = vmatmul.msk.f32.vlgmr.msrb.gmra.mxu1 %vm258_vm3, %v383_v4 }
 0x11c   :  { %v190_v5 = vpop.f32.mrf.mxu1 }
 0x11d   :  { %v191_v7 = vadd.f32 %v886_v62, %v190_v5 }
 0x11e   :  { %804 = vmatmul.msk.f32.gmra.mxu3 %vm258_vm3, %v1109_v54 }
 0x11f   :  { %v194_v8 = vmul.f32 %v191_v7, %v1109_v54 }
 0x121   :  { %800 = vmatmul.msk.f32.gmra.mxu2 %vm202_vm4, %v194_v8 }
 0x122   :  { %812 = vmatmul.msk.f32.gmra.mxu1 %vm258_vm3, %v385_v9 }
 0x197   :  { %v415_v53 = vpop.f32.mrf.mxu1 }
 0x198   :  { %v421_v59 = vmul.f32 0.35355338, %v415_v53 }
 0x199   :  { %v284_v33 = vpop.f32.mrf.mxu3 }
 0x19a   :  { %v290_v35 = vmul.f32 0.35355338, %v284_v33 }
 0x19c   :  { %v226_v11 = vpop.f32.mrf.mxu2 }
 0x19d   :  { %v1133_v12 = vadd.f32 %v887_v10, %v226_v11 }
 0x19f   :  { %v634_v13 = vsel %vm633_vm5, %v1133_v12, -inf  ;;  %v514_v20 = vsel %vm513_vm6, %v1133_v12, -inf  ;;  %v418_v0 = vpop.f32.mrf.mxu1 }
 0x1a0   :  { %635 = vmax.xlane.f32.xlu1 %v634_v13  ;;  %v422_v3 = vmul.f32 0.35355338, %v418_v0 }
 0x1a4   :  { %v229_v14 = vpop.f32.mrf.mxu2 }
 0x1a5   :  { %v230_v15 = vadd.f32 %v887_v10, %v229_v14 }
 0x1a7   :  { %v637_v19 = vsel %vm633_vm5, %v230_v15, -inf  ;;  %v517_v31 = vsel %vm513_vm6, %v230_v15, -inf }
 0x1a8   :  { %638 = vmax.xlane.f32.xlu2 %v637_v19 }
 0x1b0   :  { %515 = vmax.xlane.f32.xlu2 %v514_v20 }
 0x1b9   :  { %292 = vrot.lane.b32.xlu1 %v1065_v2, %s1027_s25 }
 0x213   :  { %v636_v21 = vpop.xlane.xlu1 %635 }
 0x214   :  { %v640_v22 = vsub.f32 %v1133_v12, %v636_v21 }
 0x216   :  { %v642_v23 = vmul.f32 1.442695, %v640_v22 }
 0x218   :  { %889 = vpow2.f32 %v642_v23 }
 0x21b   :  { %v639_v24 = vpop.xlane.xlu2 %638 }
 0x21c   :  { %v641_v25 = vsub.f32 %v230_v15, %v639_v24 }
 0x21e   :  { %v890_v26 = vpop.eup %889  ;;  %v644_v27 = vmul.f32 1.442695, %v641_v25 }
 0x21f   :  { %648 = vrot.lane.b32.xlu0 %v890_v26, %s1028_s26 }
 0x220   :  { %891 = vpow2.f32 %v644_v27 }
 0x223   :  { %v516_v39 = vpop.xlane.xlu2 %515 }
 0x224   :  { %v520_v55 = vsub.f32 %v1133_v12, %v516_v39 }
 0x226   :  { %v892_v28 = vpop.eup %891  ;;  %v522_v60 = vmul.f32 1.442695, %v520_v55 }
 0x227   :  { %650 = vrot.lane.b32.xlu0 %v892_v28, %s1028_s26 }
 0x22b   :  { %v293_v34 = vpop.permute.xlu1 %292 }
 0x22c   :  { %v298_v37 = vadd.f32 %v293_v34, %v290_v35  ;;  %v423_v61 = vadd.f32 %v421_v59, %v293_v34 }
 0x22e   :  { %v300_v38 = vsel %vm202_vm4, %v298_v37, -inf  ;;  %v425_v62 = vsel %vm202_vm4, %v423_v61, -inf }
 0x291   :  { %v649_v29 = vpop.permute.xlu0 %648 }
 0x292   :  { %v654_v30 = vsel %vm513_vm6, %v649_v29, 0.0 }
 0x293   :  { %655 = vadd.xlane.f32.xlu0 %v654_v30 }
 0x299   :  { %v651_v2 = vpop.permute.xlu0 %650 }
 0x29a   :  { %v657_v32 = vsel %vm513_vm6, %v651_v2, 0.0 }
 0x29b   :  { %518 = vmax.xlane.f32.xlu0 %v517_v31  ;;  %658 = vadd.xlane.f32.xlu2 %v657_v32 }
 0x2b3   :  { %294 = vrot.lane.b32.xlu2 %v1069_v6, %s1027_s25  ;;  %v287_v6 = vpop.f32.mrf.mxu3 }
 0x2b4   :  { %v291_v49 = vmul.f32 0.35355338, %v287_v6 }
 0x2dc   :  { %301 = vmax.xlane.f32.xlu2 %v300_v38 }
 0x306   :  { %v656_v40 = vpop.xlane.xlu0 %655 }
 0x307   :  { %893 = vrcp.f32 %v656_v40 }
 0x30d   :  { %v894_v42 = vpop.eup %893 }
 0x30e   :  { %v519_v43 = vpop.xlane.xlu0 %518  ;;  %v659_v44 = vpop.xlane.xlu2 %658  ;;  %v662_v45 = vmul.f32 %v894_v42, %v890_v26 }
 0x30f   :  { %v521_v46 = vsub.f32 %v230_v15, %v519_v43 }
 0x310   :  { %v664_v47 = vsel %vm633_vm5, %v662_v45, -inf }
 0x311   :  { %v524_v48 = vmul.f32 1.442695, %v521_v46  ;;  %665 = vmax.xlane.f32.xlu1 %v664_v47  ;;  %v867_v46 = vpack.i.bf16 %v1106_v50, %v1109_v54 }
 0x313   :  { %895 = vpow2.f32 %v524_v48 }
 0x314   :  { %897 = vpow2.f32 %v522_v60 }
 0x315   :  { %899 = vrcp.f32 %v659_v44 }
 0x316   :  { %v295_v51 = vpop.permute.xlu2 %294 }
 0x317   :  { %v299_v52 = vadd.f32 %v295_v51, %v291_v49  ;;  %v424_v4 = vadd.f32 %v422_v3, %v295_v51 }
 0x319   :  { %v1151_v56 = vpop.eup %895  ;;  %v303_v57 = vsel %vm202_vm4, %v299_v52, -inf  ;;  %v428_v5 = vsel %vm202_vm4, %v424_v4, -inf }
 0x31a   :  { %304 = vmax.xlane.f32.xlu0 %v303_v57  ;;  %v529_v58 = vsel %vm513_vm6, %v1151_v56, 0.0  ;;  %v898_v63 = vpop.eup %897 }
 0x31b   :  { %530 = vadd.xlane.f32.xlu1 %v529_v58  ;;  %v526_v1 = vsel %vm513_vm6, %v898_v63, 0.0  ;;  %v900_v7 = vpop.eup %899 }
 0x31c   :  { %v663_v8 = vmul.f32 %v900_v7, %v892_v28 }
 0x31e   :  { %v667_v9 = vsel %vm633_vm5, %v663_v8, -inf }
 0x322   :  { %426 = vmax.xlane.f32.xlu0 %v425_v62 }
 0x32a   :  { %527 = vadd.xlane.f32.xlu0 %v526_v1 }
 0x332   :  { %429 = vmax.xlane.f32.xlu0 %v428_v5 }
 0x33a   :  { %668 = vmax.xlane.f32.xlu0 %v667_v9 }
 0x34f   :  { %v302_v10 = vpop.xlane.xlu2 %301 }
 0x350   :  { %v306_v11 = vsub.f32 %v298_v37, %v302_v10 }
 0x352   :  { %v308_v12 = vmul.f32 1.442695, %v306_v11 }
 0x354   :  { %901 = vpow2.f32 %v308_v12 }
 0x35a   :  { %v902_v13 = vpop.eup %901 }
 0x35b   :  { %v312_v14 = vsel %vm202_vm4, %v902_v13, 0.0 }
 0x35c   :  { %313 = vadd.xlane.f32.xlu2 %v312_v14 }
 0x374   :  { %236 = vrot.lane.b32.xlu2 %v1109_v54, %s1029_s27 }
 0x37c   :  { %234 = vrot.lane.b32.xlu2 %v1106_v50, %s1029_s27 }
 0x384   :  { %v666_v15 = vpop.xlane.xlu1 %665 }
 0x385   :  { %v670_v19 = vsub.f32 %v662_v45, %v666_v15 }
 0x387   :  { %v672_v20 = vmul.f32 1.442695, %v670_v19 }
 0x389   :  { %903 = vpow2.f32 %v672_v20 }
 0x38d   :  { %v305_v21 = vpop.xlane.xlu0 %304 }
 0x38e   :  { %v307_v33 = vsub.f32 %v299_v52, %v305_v21  ;;  %v531_v62 = vpop.xlane.xlu1 %530 }
 0x38f   :  { %v1165_v22 = vpop.eup %903 }
 0x390   :  { %678 = vrot.lane.b32.xlu0 %v1165_v22, %s1028_s26  ;;  %v310_v35 = vmul.f32 1.442695, %v307_v33 }
 0x395   :  { %v427_v23 = vpop.xlane.xlu0 %426 }
 0x396   :  { %v431_v24 = vsub.f32 %v423_v61, %v427_v23 }
 0x398   :  { %v433_v25 = vmul.f32 1.442695, %v431_v24 }
 0x39a   :  { %905 = vpow2.f32 %v433_v25  ;;  %v51_v25 = vld [vmem:[#allocation5 + $0x20] sm:$0xff] }
 0x39b   :  { %372 = vmatpush.msrb.mxu0 %v51_v25 }
 0x39d   :  { %v528_v26 = vpop.xlane.xlu0 %527 }
 0x39e   :  { %907 = vrcp.f32 %v528_v26 }
 0x3a0   :  { %v1169_v27 = vpop.eup %905 }
 0x3a1   :  { %v437_v28 = vsel %vm202_vm4, %v1169_v27, 0.0 }
 0x3a2   :  { %438 = vadd.xlane.f32.xlu1 %v437_v28 }
 0x3a4   :  { %v908_v29 = vpop.eup %907 }
 0x3a5   :  { %v430_v30 = vpop.xlane.xlu0 %429  ;;  %v534_v2 = vmul.f32 %v908_v29, %v898_v63  ;;  %v1031_v29 = vmov 4  }
 0x3a6   :  { %v432_v31 = vsub.f32 %v424_v4, %v430_v30  ;;  %872 = vset.pattern.permute.xlu2 %v1031_v29  ;;  %v1032_v30 = vmov 3   ;;  %873 = vset.pattern.permute.xlu1 %v1031_v29 }
 0x3a7   :  { %v536_v32 = vsel %vm513_vm6, %v534_v2, -inf  ;;  %875 = vset.pattern.permute.xlu0 %v1032_v30 }
 0x3a8   :  { %v435_v34 = vmul.f32 1.442695, %v432_v31  ;;  %537 = vmax.xlane.f32.xlu2 %v536_v32 }
 0x3aa   :  { %909 = vpow2.f32 %v435_v34 }
 0x3ab   :  { %911 = vpow2.f32 %v310_v35 }
 0x3ad   :  { %v669_v40 = vpop.xlane.xlu0 %668 }
 0x3ae   :  { %v671_v43 = vsub.f32 %v663_v8, %v669_v40  ;;  %v1034_v40 = vmov 5  }
 0x3b0   :  { %v1174_v37 = vpop.eup %909  ;;  %v674_v44 = vmul.f32 1.442695, %v671_v43 }
 0x3b1   :  { %v440_v38 = vsel %vm202_vm4, %v1174_v37, 0.0  ;;  %v912_v39 = vpop.eup %911 }
 0x3b2   :  { %441 = vadd.xlane.f32.xlu1 %v440_v38  ;;  %v315_v42 = vsel %vm202_vm4, %v912_v39, 0.0  ;;  %913 = vpow2.f32 %v674_v44 }
 0x3b8   :  { %v1179_v45 = vpop.eup %913 }
 0x3ba   :  { %316 = vadd.xlane.f32.xlu0 %v315_v42 }
 0x3cb   :  { %680 = vrot.lane.b32.xlu1 %v1179_v45, %s1028_s26 }
 0x3ce   :  { %868 = vrot.lane.b32.xlu0 %v867_v46, %s1030_s28  ;;  %v52_v46 = vld [vmem:[#allocation5 + $0x28] sm:$0xff] }
 0x3cf   :  { %v314_v47 = vpop.xlane.xlu2 %313 }
 0x3d0   :  { %915 = vrcp.f32 %v314_v47 }
 0x3d1   :  { %917 = vrcp.f32 %v531_v62 }
 0x3d6   :  { %v916_v6 = vpop.eup %915 }
 0x3d7   :  { %v237_v48 = vpop.permute.xlu2 %236  ;;  %v320_v51 = vmul.f32 %v916_v6, %v902_v13  ;;  %v918_v63 = vpop.eup %917 }
 0x3d8   :  { %342 = vmatpush.msrb.mxu2 %v237_v48  ;;  %v241_v52 = vrot.slane %v237_v48, 7  ;;  %v247_v53 = vrot.slane %v237_v48, 1  ;;  %v535_v0 = vmul.f32 %v918_v63, %v1151_v56 }
 0x3da   :  { %v539_v1 = vsel %vm513_vm6, %v535_v0, -inf }
 0x3df   :  { %v235_v49 = vpop.permute.xlu2 %234 }
 0x3e0   :  { %v240_v55 = vrot.slane %v235_v49, 7  ;;  %v246_v57 = vrot.slane %v235_v49, 1  ;;  %343 = vmatpush.msrb.mxu2 %v235_v49 }
 0x3e1   :  { %805 = vmatmul.msk.f32.vlgmr.msrb.gmra.mxu2 %vm202_vm4, %v320_v51 }
 0x3e2   :  { %v1188_v58 = vsel %vm94_vm1, %v241_v52, %v240_v55  ;;  %v1192_v59 = vsel %vm111_vm2, %v246_v57, %v247_v53  ;;  %v1196_v60 = vsel %vm94_vm1, %v240_v55, %v241_v52  ;;  %v1200_v61 = vsel %vm111_vm2, %v247_v53, %v246_v57  ;;  %503 = vmatpush.msra.mxu2 %v52_v46 }
 0x3e3   :  { %v1035_v53 = vmov 0  }
 0x3f5   :  { %540 = vmax.xlane.f32.xlu1 %v539_v1  ;;  %v1036_v1 = vmov 2  }
 0x402   :  { %v679_v3 = vpop.permute.xlu0 %678 }
 0x403   :  { %v684_v4 = vsel %vm513_vm6, %v679_v3, 0.0 }
 0x404   :  { %685 = vadd.xlane.f32.xlu0 %v684_v4 }
 0x415   :  { %v439_v10 = vpop.xlane.xlu1 %438 }
 0x41b   :  { %v538_v5 = vpop.xlane.xlu2 %537 }
 0x41c   :  { %v542_v7 = vsub.f32 %v534_v2, %v538_v5 }
 0x41e   :  { %v544_v8 = vmul.f32 1.442695, %v542_v7 }
 0x420   :  { %919 = vpow2.f32 %v544_v8  ;;  %v244_v8 = vmul.f32 %v1188_v58, %v1085_v18  ;;  %v251_v18 = vmul.f32 %v1200_v61, %v1100_v41 }
 0x425   :  { %v442_v56 = vpop.xlane.xlu1 %441 }
 0x426   :  { %v920_v9 = vpop.eup %919 }
 0x427   :  { %v548_v16 = vsel %vm513_vm6, %v920_v9, 0.0 }
 0x428   :  { %549 = vadd.xlane.f32.xlu2 %v548_v16 }
 0x42d   :  { %v317_v11 = vpop.xlane.xlu0 %316 }
 0x42e   :  { %921 = vrcp.f32 %v317_v11 }
 0x42f   :  { %923 = vrcp.f32 %v439_v10  ;;  %v250_v10 = vmul.f32 %v1192_v59, %v1083_v17 }
 0x430   :  { %925 = vrcp.f32 %v442_v56 }
 0x434   :  { %v922_v12 = vpop.eup %921 }
 0x435   :  { %v321_v13 = vmul.f32 %v922_v12, %v912_v39  ;;  %v924_v20 = vpop.eup %923  ;;  %v1033_v39 = vmov 1  }
 0x436   :  { %v445_v24 = vmul.f32 %v924_v20, %v1169_v27  ;;  %v926_v26 = vpop.eup %925 }
 0x437   :  { %806 = vmatmul.msk.f32.gmra.mxu2 %vm202_vm4, %v321_v13  ;;  %v446_v28 = vmul.f32 %v926_v26, %v1174_v37 }
 0x43d   :  { %v681_v14 = vpop.permute.xlu1 %680 }
 0x43e   :  { %v687_v15 = vsel %vm513_vm6, %v681_v14, 0.0 }
 0x43f   :  { %688 = vadd.xlane.f32.xlu1 %v687_v15  ;;  %v53_v15 = vld [vmem:[#allocation5 + $0x30] sm:$0xff] }
 0x440   :  { %v869_v19 = vpop.permute.xlu0 %868  ;;  %623 = vmatpush.msra.mxu0 %v53_v15 }
 0x441   :  { %v870_v21 = vunpack.i.l.bf16 %v869_v19  ;;  %v871_v23 = vunpack.i.h.bf16 %v869_v19 }
 0x443   :  { %473 = vmatpush.msra.mxu3 %v870_v21 }
 0x445   :  { %474 = vmatpush.msra.mxu3 %v871_v23 }
 0x446   :  { %813 = vmatmul.msk.f32.vlgmr.msra.gmra.mxu3 %vm202_vm4, %v445_v24 }
 0x44e   :  { %814 = vmatmul.msk.f32.gmra.mxu3 %vm202_vm4, %v446_v28 }
 0x464   :  { %v345_v2 = vpop.f32.mrf.mxu2 }
 0x465   :  { %807 = vmatmul.msk.f32.vlgmr.msrb.gmra.mxu0 %vm258_vm3, %v345_v2 }
 0x468   :  { %v541_v31 = vpop.xlane.xlu1 %540 }
 0x469   :  { %v543_v27 = vsub.f32 %v535_v0, %v541_v31 }
 0x46b   :  { %v546_v32 = vmul.f32 1.442695, %v543_v27 }
 0x46d   :  { %927 = vpow2.f32 %v546_v32 }
 0x473   :  { %v928_v33 = vpop.eup %927 }
 0x474   :  { %v551_v34 = vsel %vm513_vm6, %v928_v33, 0.0 }
 0x475   :  { %552 = vadd.xlane.f32.xlu1 %v551_v34 }
 0x477   :  { %v686_v35 = vpop.xlane.xlu0 %685 }
 0x478   :  { %929 = vrcp.f32 %v686_v35 }
 0x47e   :  { %v930_v37 = vpop.eup %929 }
 0x47f   :  { %v692_v38 = vmul.f32 %v930_v37, %v1165_v22 }
 0x481   :  { %696 = vperm.xlu0 %875, %v692_v38   ;;  %707 = vperm.xlu2 %872, %v692_v38  }
 0x489   :  { %874 = vset.pattern.permute.xlu2 %v1033_v39  ;;  %884 = vset.pattern.permute.xlu0 %v1034_v40 }
 0x49b   :  { %v550_v42 = vpop.xlane.xlu2 %549 }
 0x49c   :  { %931 = vrcp.f32 %v550_v42 }
 0x4a2   :  { %v932_v43 = vpop.eup %931 }
 0x4a3   :  { %v556_v44 = vmul.f32 %v932_v43, %v920_v9 }
 0x4a5   :  { %571 = vperm.xlu2 %874, %v556_v44  }
 0x4ad   :  { %876 = vset.pattern.permute.xlu2 %v1034_v40 }
 0x4ae   :  { %727 = vperm.xlu2 %876, %v692_v38   ;;  %v888_v38 = vld [vmem:[#allocation5 + $0x40] ss:$0 sm:$0xff] }
 0x4b2   :  { %v689_v47 = vpop.xlane.xlu1 %688 }
 0x4b3   :  { %933 = vrcp.f32 %v689_v47 }
 0x4b6   :  { %878 = vset.pattern.permute.xlu2 %v1032_v30 }
 0x4b9   :  { %v934_v48 = vpop.eup %933 }
 0x4ba   :  { %v348_v22 = vpop.f32.mrf.mxu2  ;;  %v693_v6 = vmul.f32 %v934_v48, %v1179_v45 }
 0x4bb   :  { %808 = vmatmul.msk.f32.gmra.mxu0 %vm258_vm3, %v348_v22 }
 0x4bc   :  { %711 = vperm.xlu1 %873, %v693_v6   ;;  %701 = vperm.xlu2 %878, %v693_v6  }
 0x4c4   :  { %879 = vset.pattern.permute.xlu2 %v1034_v40  ;;  %877 = vset.pattern.permute.xlu1 %v1033_v39 }
 0x4c5   :  { %731 = vperm.xlu2 %879, %v693_v6  }
 0x4c9   :  { %v476_v49 = vpop.f32.mrf.mxu3 }
 0x4ca   :  { %815 = vmatmul.msk.f32.vlgmr.msra.gmra.mxu2 %vm258_vm3, %v476_v49 }
 0x4cd   :  { %882 = vset.pattern.permute.xlu2 %v1035_v53 }
 0x4d1   :  { %v479_v51 = vpop.f32.mrf.mxu3 }
 0x4d2   :  { %816 = vmatmul.msk.f32.gmra.mxu2 %vm258_vm3, %v479_v51 }
 0x4db   :  { %v708_v45 = vpop.permute.xlu2 %707 }
 0x4dc   :  { %v714_v62 = vmul.f32 %v708_v45, %v1106_v50 }
 0x4e2   :  { %v374_v35 = vpop.f32.mrf.mxu0 }
 0x4e3   :  { %v380_v40 = vadd.f32 %v888_v38, %v374_v35 }
 0x4e8   :  { %v553_v52 = vpop.xlane.xlu1 %552 }
 0x4e9   :  { %935 = vrcp.f32 %v553_v52 }
 0x4ef   :  { %v936_v55 = vpop.eup %935 }
 0x4f0   :  { %v557_v57 = vmul.f32 %v936_v55, %v928_v33 }
 0x4f2   :  { %575 = vperm.xlu1 %877, %v557_v57  }
 0x4fa   :  { %718 = vrot.lane.b32.xlu1 %v714_v62, %s1029_s27 }
 0x4fb   :  { %880 = vset.pattern.permute.xlu1 %v1035_v53 }
 0x4ff   :  { %v572_v63 = vpop.permute.xlu2 %571 }
 0x500   :  { %v578_v0 = vmul.f32 %v572_v63, %v1106_v50  ;;  %v697_v50 = vpop.permute.xlu0 %696 }
 0x501   :  { %v704_v16 = vmul.f32 %v697_v50, %v244_v8 }
 0x502   :  { %582 = vrot.lane.b32.xlu2 %v578_v0, %s1029_s27 }
 0x508   :  { %v728_v9 = vpop.permute.xlu2 %727 }
 0x509   :  { %v734_v12 = vmul.f32 %v728_v9, %v250_v10 }
 0x50a   :  { %565 = vperm.xlu2 %882, %v557_v57  }
 0x512   :  { %883 = vset.pattern.permute.xlu2 %v1036_v1 }
 0x513   :  { %595 = vperm.xlu2 %883, %v557_v57  }
 0x516   :  { %v702_v14 = vpop.permute.xlu2 %701 }
 0x51f   :  { %v732_v19 = vpop.permute.xlu2 %731 }
 0x520   :  { %v735_v21 = vmul.f32 %v732_v19, %v251_v18 }
 0x52e   :  { %v712_v3 = vpop.permute.xlu1 %711 }
 0x52f   :  { %v715_v4 = vmul.f32 %v712_v3, %v1109_v54 }
 0x531   :  { %720 = vrot.lane.b32.xlu1 %v715_v4, %s1029_s27 }
 0x538   :  { %v377_v37 = vpop.f32.mrf.mxu0 }
 0x539   :  { %560 = vperm.xlu1 %880, %v556_v44   ;;  %v381_v22 = vadd.f32 %v888_v38, %v377_v37 }
 0x541   :  { %881 = vset.pattern.permute.xlu1 %v1036_v1 }
 0x542   :  { %591 = vperm.xlu1 %881, %v556_v44  }
 0x54d   :  { %v505_v39 = vpop.f32.mrf.mxu2 }
 0x54e   :  { %v511_v43 = vadd.f32 %v505_v39, %v380_v40 }
 0x555   :  { %v508_v48 = vpop.f32.mrf.mxu2 }
 0x556   :  { %v512_v49 = vadd.f32 %v508_v48, %v381_v22 }
 0x55c   :  { %v583_v25 = vpop.permute.xlu2 %582 }
 0x564   :  { %v576_v5 = vpop.permute.xlu1 %575 }
 0x565   :  { %v579_v7 = vmul.f32 %v576_v5, %v1109_v54  ;;  %v245_v54 = vmul.f32 %v1196_v60, %v1097_v36  ;;  %v54_v36 = vld [vmem:[#allocation5 + $0x38] sm:$0xff]  ;;  %v566_v60 = vpop.permute.xlu2 %565 }
 0x566   :  { %763 = vmatpush.msra.mxu1 %v54_v36 }
 0x567   :  { %584 = vrot.lane.b32.xlu1 %v579_v7, %s1029_s27  ;;  %v705_v20 = vmul.f32 %v702_v14, %v245_v54  ;;  %v569_v41 = vmul.f32 %v566_v60, %v245_v54 }
 0x56c   :  { %v719_v11 = vpop.permute.xlu1 %718 }
 0x56d   :  { %v724_v56 = vadd.f32 %v719_v11, %v704_v16  ;;  %v596_v2 = vpop.permute.xlu2 %595 }
 0x56e   :  { %v599_v31 = vmul.f32 %v596_v2, %v251_v18 }
 0x56f   :  { %v736_v13 = vadd.f32 %v734_v12, %v724_v56 }
 0x571   :  { %740 = vrot.lane.b32.xlu0 %v736_v13, %s1026_s24 }
 0x5a3   :  { %v721_v58 = vpop.permute.xlu1 %720 }
 0x5a4   :  { %v725_v17 = vadd.f32 %v721_v58, %v705_v20 }
 0x5a6   :  { %v737_v59 = vadd.f32 %v735_v21, %v725_v17 }
 0x5a8   :  { %742 = vrot.lane.b32.xlu0 %v737_v59, %s1026_s24 }
 0x5ab   :  { %v561_v23 = vpop.permute.xlu1 %560 }
 0x5ac   :  { %v568_v24 = vmul.f32 %v561_v23, %v244_v8 }
 0x5ae   :  { %v588_v28 = vadd.f32 %v583_v25, %v568_v24 }
 0x5b4   :  { %v592_v26 = vpop.permute.xlu1 %591 }
 0x5b5   :  { %v598_v29 = vmul.f32 %v592_v26, %v250_v10 }
 0x5b7   :  { %v600_v30 = vadd.f32 %v598_v29, %v588_v28 }
 0x5b9   :  { %817 = vmatmul.msk.f32.vlgmr.msra.gmra.mxu0 %vm258_vm3, %v600_v30 }
 0x5d9   :  { %v585_v61 = vpop.permute.xlu1 %584 }
 0x5da   :  { %v589_v27 = vadd.f32 %v585_v61, %v569_v41 }
 0x5dc   :  { %v601_v32 = vadd.f32 %v599_v31, %v589_v27 }
 0x5de   :  { %818 = vmatmul.msk.f32.gmra.mxu0 %vm258_vm3, %v601_v32 }
 0x5e3   :  { %v741_v33 = vpop.permute.xlu0 %740 }
 0x5e4   :  { %819 = vmatmul.msk.f32.vlgmr.msra.gmra.mxu1 %vm258_vm3, %v741_v33 }
 0x61a   :  { %v743_v34 = vpop.permute.xlu0 %742 }
 0x61b   :  { %820 = vmatmul.msk.f32.gmra.mxu1 %vm258_vm3, %v743_v34 }
 0x636   :  { %v625_v42 = vpop.f32.mrf.mxu0 }
 0x637   :  { %v631_v44 = vadd.f32 %v625_v42, %v511_v43 }
 0x65b   :  { %v628_v6 = vpop.f32.mrf.mxu0 }
 0x65c   :  { %v632_v51 = vadd.f32 %v628_v6, %v512_v49 }
 0x661   :  { %v765_v46 = vpop.f32.mrf.mxu1 }
 0x662   :  { %v771_v47 = vadd.f32 %v765_v46, %v631_v44 }
 0x664   :  { %773 = vst [vmem:[#allocation7] sm:$0xff] %v771_v47 }
 0x698   :  { %v768_v52 = vpop.f32.mrf.mxu1 }
 0x699   :  { %v772_v53 = vadd.f32 %v768_v52, %v632_v51 }
 0x69b   :  { %774 = vst [vmem:[#allocation7 + $0x8] sm:$0xff] %v772_v53 }
 0x69c   :  { %787 = dma.vmem_to_hbm [thread:$0]  %s780_s30, 256, %s782_s5, [#allocation4], %s1016_s17, %s1016_s17, %s1017_s18  }
 0x69d   :  { %1013 = dma.done.wait [#allocation4], 256  }
 0x69e   :  { %1014 = vsyncadd [#allocation4], 4294967040 }
 0x69f   :  { %792 = vsyncpa [#allocation3], 1 }
 0x6a0   :  { %793 = vsyncpa [#allocation6], 1 }
 0x6a1   :  { %794 = vsyncpa [#allocation4], 1 }

</bundles_post_ra>
